<compile_context>
chip_gen: v7x
topology: tpu7x:2x2x1
jax: 0.10.0
libtpu: 0.0.40
codegen_flags: <defaults>
</compile_context>

<pallas_src>
import functools

import jax
import jax.numpy as jnp
from jax.experimental import pallas as pl
from jax.experimental.pallas import tpu as pltpu

MARGIN = 1000.0
LAMBDA_REG = 1e-4


def _loss_partial_kernel(score_ref, y_ref, acc_ref, *, margin, valid_rows,
                         tile_rows, blocks_per_core, group, needs_any_mask):
    """Folds a (tile_rows, D) block into a resident (group, D) partial sum."""
    c = pl.program_id(0)           # TensorCore split axis ("parallel")
    i = pl.program_id(1)           # reduction axis ("arbitrary")

    @pl.when(i == 0)
    def _():
        acc_ref[...] = jnp.zeros_like(acc_ref)

    # Upcast in-register; inputs may be bf16/f32/etc.
    s = score_ref[...].astype(jnp.float32)
    y = y_ref[...].astype(jnp.float32)

    h = jnp.maximum(jnp.float32(margin) - s, jnp.float32(0.0))
    s2 = s * s
    h2 = h * h
    # y*s^2 + (1-y)*h^2  ==  h^2 + y*(s^2 - h^2)   (fewer VPU ops)
    contrib = h2 + y * (s2 - h2)                       # (tile_rows, D) f32

    groups = tile_rows // group

    def fold(x):
        # Pure vreg-group relabeling + elementwise VPU adds (no XLU work).
        if groups == 1:
            return x
        return x.reshape(groups, group, x.shape[-1]).sum(axis=0)

    if needs_any_mask:
        # Unclamped global row offset of this block (the index_map clamps the
        # actual DMA to stay in bounds; fully-OOB duplicate blocks on core 1
        # are masked to zero here).
        row0 = (c * blocks_per_core + i) * tile_rows
        block_needs_mask = row0 + tile_rows > valid_rows

        @pl.when(block_needs_mask)
        def _():
            row_ids = row0 + jax.lax.broadcasted_iota(jnp.int32,
                                                      contrib.shape, 0)
            masked = jnp.where(row_ids < valid_rows, contrib,
                               jnp.float32(0.0))
            acc_ref[...] += fold(masked)

        @pl.when(jnp.logical_not(block_needs_mask))
        def _():
            acc_ref[...] += fold(contrib)
    else:
        acc_ref[...] += fold(contrib)


def _round_up(x, m):
    return (x + m - 1) // m * m


def _vmem_budget_bytes():
    """Generation-aware scoped-VMEM budget (~half of physical VMEM)."""
    try:
        phys = int(pltpu.get_tpu_info().vmem_capacity_bytes)
    except Exception:
        phys = 64 << 20  # conservative (v7x-sized) fallback
    return max(16 << 20, min(phys // 2, 64 << 20))


def custom_loss(score, y, *, lambda_reg=LAMBDA_REG, margin=MARGIN):
    """Pallas equivalent of Custom_Loss.forward(score, y)."""
    assert score.shape == y.shape, (score.shape, y.shape)
    if score.ndim != 2:
        score = score.reshape(-1, score.shape[-1])
        y = y.reshape(-1, y.shape[-1])
    B, D = score.shape
    assert B >= 1 and D >= 1

    s_isize = jnp.dtype(score.dtype).itemsize
    y_isize = jnp.dtype(y.dtype).itemsize

    # --- Byte-budgeted tile sizing -----------------------------------------
    budget = _vmem_budget_bytes()
    slack = 4 << 20
    # Per-row VMEM footprint: 2 pipeline buffers per input (native dtype) plus
    # ~5 tile-sized f32 temporaries for the elementwise chain.
    bytes_per_row = D * (2 * (s_isize + y_isize) + 5 * 4)
    rows_by_budget = max(8, (budget - slack) // bytes_per_row)
    # Target ~4 MiB per input block (past that, roofline returns diminish).
    rows_by_target = max(8, (4 << 20) // (D * max(s_isize, y_isize)))
    tile_rows = int(min(rows_by_budget, rows_by_target, _round_up(B, 8)))
    tile_rows = max(8, tile_rows // 8 * 8)
    if tile_rows >= 64:
        tile_rows = tile_rows // 64 * 64   # allow the wide (64, D) accumulator
    group = 64 if tile_rows % 64 == 0 else 8

    # --- Grid: (TensorCore split, row-block reduction) ----------------------
    total_blocks = pl.cdiv(B, tile_rows)
    core_split = 2 if total_blocks > 1 else 1     # 2 TCs on v7x; serial elsewhere
    blocks_per_core = pl.cdiv(total_blocks, core_split)
    needs_any_mask = core_split * blocks_per_core * tile_rows > B

    def in_map(c, i):
        # Clamp so a (possible) overflow block on core 1 re-reads the last
        # valid block instead of going out of bounds; it is masked to zero.
        blk = jnp.minimum(c * blocks_per_core + i, total_blocks - 1)
        return (blk, 0)

    vmem_need = tile_rows * bytes_per_row + 2 * group * D * 4 + slack
    vmem_bytes = int(min(budget, max(vmem_need, 16 << 20)))

    partial = pl.pallas_call(
        functools.partial(
            _loss_partial_kernel,
            margin=float(margin),
            valid_rows=B,
            tile_rows=tile_rows,
            blocks_per_core=int(blocks_per_core),
            group=group,
            needs_any_mask=bool(needs_any_mask),
        ),
        out_shape=jax.ShapeDtypeStruct((core_split * group, D), jnp.float32),
        grid_spec=pltpu.PrefetchScalarGridSpec(
            num_scalar_prefetch=0,
            grid=(core_split, int(blocks_per_core)),
            # TODO(synk): sweep pipeline_mode=pl.Buffered(3) on the inputs if
            # xprof shows exposed DMA at step boundaries after block enlarging.
            in_specs=[
                pl.BlockSpec((tile_rows, D), in_map),
                pl.BlockSpec((tile_rows, D), in_map),
            ],
            # Per-core resident accumulator block; written back once per core.
            out_specs=pl.BlockSpec((group, D), lambda c, i: (c, 0)),
        ),
        compiler_params=pltpu.CompilerParams(
            dimension_semantics=("parallel", "arbitrary"),
            vmem_limit_bytes=vmem_bytes,
        ),
    )(score, y)

    # Epilogue (tiny, core_split*group*D elements): cross-lane reduce + mean;
    # the 0.5 factor is folded into the divide.
    total = jnp.sum(partial)
    loss_1 = total / jnp.float32(2 * B * D)
    loss_2 = jnp.float32(0.0)   # as in the reference module (loss_2 = 0)
    return loss_1 + jnp.float32(lambda_reg) * loss_2


def _reference(score, y, lambda_reg=LAMBDA_REG, margin=MARGIN):
    score = score.astype(jnp.float32)
    y = y.astype(jnp.float32)
    pos = y * score**2
    neg = (1.0 - y) * jnp.maximum(margin - score, 0.0) ** 2
    return jnp.mean(0.5 * (pos + neg)) + lambda_reg * 0.0


if __name__ == "__main__":
    key = jax.random.PRNGKey(0)
    k1, k2 = jax.random.split(key)

    # Small shapes; B=20 (not a multiple of 8) exercises the tail-row mask.
    B, D = 20, 128
    score = jax.random.uniform(k1, (B, D), dtype=jnp.float32) * 2000.0 - 500.0
    y = (jax.random.uniform(k2, (B, D)) > 0.5).astype(jnp.float32)

    out = jax.block_until_ready(custom_loss(score, y))
    ref = jax.block_until_ready(_reference(score, y))

    rel_err = abs(float(out) - float(ref)) / (abs(float(ref)) + 1e-12)
    assert rel_err < 1e-4, f"mismatch: pallas={out} ref={ref} rel_err={rel_err}"

    print("KERNEL_OK")
</pallas_src>

<mosaic_0001>
module attributes {stable_mosaic.version = 11 : i64} {
  func.func @_loss_partial_kernel(%arg0: i32, %arg1: i32, %arg2: memref<24x128xf32, #tpu.memory_space<vmem>>, %arg3: memref<24x128xf32, #tpu.memory_space<vmem>>, %arg4: memref<8x128xf32, #tpu.memory_space<vmem>>) attributes {dimension_semantics = [#tpu.dimension_semantics<parallel>, #tpu.dimension_semantics<arbitrary>], iteration_bounds = array<i64: 1, 1>, scalar_prefetch = 0 : i64, scratch_operands = 0 : i64, tpu.core_type = #tpu.core_type<tc>, window_params = [{transform_indices = @transform_0, window_bounds = array<i64: 24, 128>}, {transform_indices = @transform_1, window_bounds = array<i64: 24, 128>}, {transform_indices = @transform_2, window_bounds = array<i64: 8, 128>}]} {
    %c0_i32 = arith.constant 0 : i32
    %0 = arith.cmpi eq, %arg1, %c0_i32 : i32
    %1 = arith.extui %0 : i1 to i32
    %c0_i32_0 = arith.constant 0 : i32
    %2 = arith.cmpi ne, %1, %c0_i32_0 : i32
    scf.if %2 {
      %cst_8 = arith.constant 0.000000e+00 : f32
      %24 = vector.broadcast %cst_8 : f32 to vector<8x128xf32>
      %c0_9 = arith.constant 0 : index
      %c0_10 = arith.constant 0 : index
      %25 = vector.load %arg4[%c0_9, %c0_10] : memref<8x128xf32, #tpu.memory_space<vmem>>, vector<8x128xf32>
      tpu.vector_store %arg4[%c0_9, %c0_10], %24 {strides = array<i32>} : memref<8x128xf32, #tpu.memory_space<vmem>>, vector<8x128xf32>,
    } else {
    }
    %c0 = arith.constant 0 : index
    %c0_1 = arith.constant 0 : index
    %3 = vector.load %arg2[%c0, %c0_1] : memref<24x128xf32, #tpu.memory_space<vmem>>, vector<24x128xf32>
    %c0_2 = arith.constant 0 : index
    %c0_3 = arith.constant 0 : index
    %4 = vector.load %arg3[%c0_2, %c0_3] : memref<24x128xf32, #tpu.memory_space<vmem>>, vector<24x128xf32>
    %cst = arith.constant 1.000000e+03 : f32
    %5 = vector.broadcast %cst : f32 to vector<24x128xf32>
    %6 = arith.subf %5, %3 : vector<24x128xf32>
    %cst_4 = arith.constant 0.000000e+00 : f32
    %7 = vector.broadcast %cst_4 : f32 to vector<24x128xf32>
    %8 = arith.maximumf %6, %7 : vector<24x128xf32>
    %9 = arith.mulf %3, %3 : vector<24x128xf32>
    %10 = arith.mulf %8, %8 : vector<24x128xf32>
    %11 = arith.subf %9, %10 : vector<24x128xf32>
    %12 = arith.mulf %4, %11 : vector<24x128xf32>
    %13 = arith.addf %10, %12 : vector<24x128xf32>
    %c1_i32 = arith.constant 1 : i32
    %14 = arith.muli %arg0, %c1_i32 : i32
    %15 = arith.addi %14, %arg1 : i32
    %c24_i32 = arith.constant 24 : i32
    %16 = arith.muli %15, %c24_i32 : i32
    %c24_i32_5 = arith.constant 24 : i32
    %17 = arith.addi %16, %c24_i32_5 : i32
    %c20_i32 = arith.constant 20 : i32
    %18 = arith.cmpi sgt, %17, %c20_i32 : i32
    %19 = arith.extui %18 : i1 to i32
    %c0_i32_6 = arith.constant 0 : i32
    %20 = arith.cmpi ne, %19, %c0_i32_6 : i32
    scf.if %20 {
      %24 = tpu.iota {dimensions = array<i32: 0>} : vector<24x128xi32>
      %25 = vector.broadcast %16 : i32 to vector<24x128xi32>
      %26 = arith.addi %25, %24 : vector<24x128xi32>
      %c20_i32_8 = arith.constant 20 : i32
      %27 = vector.broadcast %c20_i32_8 : i32 to vector<24x128xi32>
      %28 = arith.cmpi slt, %26, %27 : vector<24x128xi32>
      %cst_9 = arith.constant 0.000000e+00 : f32
      %29 = vector.broadcast %cst_9 : f32 to vector<24x128xf32>
      %30 = arith.select %28, %13, %29 : vector<24x128xi1>, vector<24x128xf32>
      %c0_10 = arith.constant 0 : index
      %c0_11 = arith.constant 0 : index
      %31 = vector.load %arg4[%c0_10, %c0_11] : memref<8x128xf32, #tpu.memory_space<vmem>>, vector<8x128xf32>
      %32 = vector.shape_cast %30 : vector<24x128xf32> to vector<3x8x128xf32>
      %cst_12 = arith.constant dense<0.000000e+00> : vector<8x128xf32>
      %33 = vector.multi_reduction <add>, %32, %cst_12 [0] : vector<3x8x128xf32> to vector<8x128xf32>
      %34 = arith.addf %31, %33 : vector<8x128xf32>
      %c0_13 = arith.constant 0 : index
      %c0_14 = arith.constant 0 : index
      %35 = vector.load %arg4[%c0_13, %c0_14] : memref<8x128xf32, #tpu.memory_space<vmem>>, vector<8x128xf32>
      tpu.vector_store %arg4[%c0_13, %c0_14], %34 {strides = array<i32>} : memref<8x128xf32, #tpu.memory_space<vmem>>, vector<8x128xf32>,
    } else {
    }
    %true = arith.constant true
    %21 = arith.xori %18, %true : i1
    %22 = arith.extui %21 : i1 to i32
    %c0_i32_7 = arith.constant 0 : i32
    %23 = arith.cmpi ne, %22, %c0_i32_7 : i32
    scf.if %23 {
      %c0_8 = arith.constant 0 : index
      %c0_9 = arith.constant 0 : index
      %24 = vector.load %arg4[%c0_8, %c0_9] : memref<8x128xf32, #tpu.memory_space<vmem>>, vector<8x128xf32>
      %25 = vector.shape_cast %13 : vector<24x128xf32> to vector<3x8x128xf32>
      %cst_10 = arith.constant dense<0.000000e+00> : vector<8x128xf32>
      %26 = vector.multi_reduction <add>, %25, %cst_10 [0] : vector<3x8x128xf32> to vector<8x128xf32>
      %27 = arith.addf %24, %26 : vector<8x128xf32>
      %c0_11 = arith.constant 0 : index
      %c0_12 = arith.constant 0 : index
      %28 = vector.load %arg4[%c0_11, %c0_12] : memref<8x128xf32, #tpu.memory_space<vmem>>, vector<8x128xf32>
      tpu.vector_store %arg4[%c0_11, %c0_12], %27 {strides = array<i32>} : memref<8x128xf32, #tpu.memory_space<vmem>>, vector<8x128xf32>,
    } else {
    }
    return
  }
  func.func @transform_0(%arg0: i32, %arg1: i32) -> (i32, i32) {
    %c1_i32 = arith.constant 1 : i32
    %0 = arith.muli %arg0, %c1_i32 : i32
    %1 = arith.addi %0, %arg1 : i32
    %c0_i32 = arith.constant 0 : i32
    %2 = arith.minsi %1, %c0_i32 : i32
    %c0_i32_0 = arith.constant 0 : i32
    %c0_i32_1 = arith.constant 0 : i32
    return %2, %c0_i32_0 : i32, i32
  }
  func.func @transform_1(%arg0: i32, %arg1: i32) -> (i32, i32) {
    %c1_i32 = arith.constant 1 : i32
    %0 = arith.muli %arg0, %c1_i32 : i32
    %1 = arith.addi %0, %arg1 : i32
    %c0_i32 = arith.constant 0 : i32
    %2 = arith.minsi %1, %c0_i32 : i32
    %c0_i32_0 = arith.constant 0 : i32
    %c0_i32_1 = arith.constant 0 : i32
    return %2, %c0_i32_0 : i32, i32
  }
  func.func @transform_2(%arg0: i32, %arg1: i32) -> (i32, i32) {
    %c0_i32 = arith.constant 0 : i32
    %c0_i32_0 = arith.constant 0 : i32
    return %arg0, %c0_i32 : i32, i32
  }
}

</mosaic_0001>

<bundles_post_ra>
// kernel: tpu_custom_call.1
= control target key start
LH: loop header
LB: loop body
LE: loop exit
PB: predicated region body
PF: predicated region fallthrough
CT: control target
= control target key end

     0   :  { %7 = vsyncpa [#allocation3], 0  ;;  %s281_s0 = inlined_call_operand.hbm [shape: f32[20,128], index: 0, kind: input, shape index: {}]   ;;  %s282_s1 = inlined_call_operand.hbm [shape: f32[20,128], index: 1, kind: input, shape index: {}]   ;;  %s283_s2 = inlined_call_operand.hbm [shape: f32[8,128], index: 2, kind: output, shape index: {}]  }
   0x1   :  { %8 = vsyncpa [#allocation6], 0 }
   0x2   :  { %9 = vsyncpa [#allocation4], 0  ;;  %s225_s9 = smov [#allocation2]   ;;  %s153_s13 = scalar_lea.hbm %s281_s0, 384 }
   0x3   :  { %s21_s10 = sshll.u32 %s225_s9, 4  ;;  %p154_p0 = scmp.ne.s32.totalorder %s281_s0, %s153_s13  ;;  %s22_s10 = int_to_ptr.vmem [resolvable:$true] %s21_s10 }
   0x4   :  { %p157_p1 = scmp.lt.u32.totalorder %s153_s13, %s281_s0 }
   0x6   :  { %p159_p2 = pnand %p157_p1, %p154_p0 }
   0x8   :  { %162 = shalt.err (!%p159_p2)
}
   0x9   :  { %s163_s18 = scalar_lea.vmem %s22_s10, 384  ;;  %p168_p4 = scmp.lt.s32.totalorder %s22_s10, %s22_s10 }
   0xa   :  { %p164_p3 = scmp.ne.s32.totalorder %s22_s10, %s163_s18  ;;  %p169_p5 = scmp.lt.s32.totalorder %s163_s18, %s163_s18 }
   0xc   :  { %p170_p6 = por %p169_p5, %p168_p4 }
   0xe   :  { %p171_p7 = pnand %p170_p6, %p164_p3 }
  0x10   :  { %174 = shalt.err (!%p171_p7)
}
  0x11   :  { %s226_s19 = smov 128   ;;  %s227_s20 = smov 8  }
  0x12   :  { %27 = dma.hbm_to_vmem [thread:$0]  %s281_s0, 384, %s22_s10, [#allocation3], %s226_s19, %s226_s19, %s227_s20  }
  0x13   :  { %s228_s23 = smov [#allocation5]   ;;  %s175_s27 = scalar_lea.hbm %s282_s1, 384 }
  0x14   :  { %s39_s24 = sshll.u32 %s228_s23, 4  ;;  %p176_p8 = scmp.ne.s32.totalorder %s282_s1, %s175_s27  ;;  %s40_s24 = int_to_ptr.vmem [resolvable:$true] %s39_s24 }
  0x15   :  { %p179_p9 = scmp.lt.u32.totalorder %s175_s27, %s282_s1 }
  0x17   :  { %p181_p10 = pnand %p179_p9, %p176_p8 }
  0x19   :  { %184 = shalt.err (!%p181_p10)
}
  0x1a   :  { %s185_s4 = scalar_lea.vmem %s40_s24, 384  ;;  %p190_p12 = scmp.lt.s32.totalorder %s40_s24, %s40_s24 }
  0x1b   :  { %p186_p11 = scmp.ne.s32.totalorder %s40_s24, %s185_s4  ;;  %p191_p13 = scmp.lt.s32.totalorder %s185_s4, %s185_s4 }
  0x1d   :  { %p192_p0 = por %p191_p13, %p190_p12 }
  0x1f   :  { %p193_p1 = pnand %p192_p0, %p186_p11 }
  0x21   :  { %196 = shalt.err (!%p193_p1)
}
  0x22   :  { %45 = dma.hbm_to_vmem [thread:$0]  %s282_s1, 384, %s40_s24, [#allocation6], %s226_s19, %s226_s19, %s227_s20  }
  0x23   :  { %219 = dma.done.wait [#allocation3], 384  }
  0x24   :  { %220 = vsyncadd [#allocation3], 4294966912 }
  0x25   :  { %221 = dma.done.wait [#allocation6], 384  }
  0x26   :  { %222 = vsyncadd [#allocation6], 4294966912  ;;  %v99_v0 = vlaneseq  ;;  %v65_v1 = vld [vmem:[#allocation2] sm:$0xff]  ;;  %v66_v2 = vld [vmem:[#allocation2 + $0x8] sm:$0xff]  ;;  %s229_s1 = smov [#allocation7]  }
  0x27   :  { %v67_v3 = vld [vmem:[#allocation2 + $0x10] sm:$0xff]  ;;  %v71_v4 = vsub.f32 1000.0, %v65_v1  ;;  %v72_v5 = vsub.f32 1000.0, %v66_v2  ;;  %v77_v7 = vmul.f32 %v65_v1, %v65_v1  ;;  %v78_v8 = vmul.f32 %v66_v2, %v66_v2  ;;  %v68_v17 = vld [vmem:[#allocation5] sm:$0xff]  ;;  %v69_v18 = vld [vmem:[#allocation5 + $0x8] sm:$0xff]  ;;  %s133_s6 = sshll.u32 %s229_s1, 4  ;;  %s134_s6 = int_to_ptr.vmem [resolvable:$true] %s133_s6 }
  0x28   :  { %v73_v6 = vsub.f32 1000.0, %v67_v3  ;;  %v100_v9 = vshrl.u32 %v99_v0, 7  ;;  %v79_v13 = vmul.f32 %v67_v3, %v67_v3  ;;  %v70_v19 = vld [vmem:[#allocation5 + $0x10] sm:$0xff]  ;;  %s197_s7 = scalar_lea.vmem %s134_s6, 128  ;;  %p202_p3 = scmp.lt.s32.totalorder %s134_s6, %s134_s6 }
  0x29   :  { %v74_v10 = vmax.f32 %v71_v4, 0.0  ;;  %v75_v11 = vmax.f32 %v72_v5, 0.0  ;;  %p198_p2 = scmp.ne.s32.totalorder %s134_s6, %s197_s7  ;;  %p203_p4 = scmp.lt.s32.totalorder %s197_s7, %s197_s7 }
  0x2a   :  { %v76_v12 = vmax.f32 %v73_v6, 0.0  ;;  %v102_v20 = vadd.s32 16, %v100_v9 }
  0x2b   :  { %v80_v14 = vmul.f32 %v74_v10, %v74_v10  ;;  %v81_v15 = vmul.f32 %v75_v11, %v75_v11  ;;  %p204_p5 = por %p203_p4, %p202_p3 }
  0x2c   :  { %v82_v16 = vmul.f32 %v76_v12, %v76_v12  ;;  %vm109_vm0 = vcmp.lt.s32.totalorder %v102_v20, 20 }
  0x2d   :  { %v83_v21 = vsub.f32 %v77_v7, %v80_v14  ;;  %v84_v22 = vsub.f32 %v78_v8, %v81_v15  ;;  %p205_p6 = pnand %p204_p5, %p198_p2 }
  0x2e   :  { %v85_v23 = vsub.f32 %v79_v13, %v82_v16 }
  0x2f   :  { %v86_v24 = vmul.f32 %v83_v21, %v68_v17  ;;  %v87_v25 = vmul.f32 %v84_v22, %v69_v18 }
  0x30   :  { %v88_v26 = vmul.f32 %v85_v23, %v70_v19 }
  0x31   :  { %v89_v27 = vadd.f32 %v86_v24, %v80_v14  ;;  %v90_v28 = vadd.f32 %v87_v25, %v81_v15 }
  0x32   :  { %v91_v29 = vadd.f32 %v88_v26, %v82_v16 }
  0x33   :  { %v114_v31 = vadd.f32 %v90_v28, %v89_v27 }
  0x34   :  { %v112_v30 = vsel %vm109_vm0, %v91_v29, 0.0 }
  0x35   :  { %v115_v32 = vadd.f32 %v114_v31, %v112_v30 }
  0x37   :  { %117 = vst [vmem:[#allocation7] sm:$0xff] %v115_v32 }
  0x38   :  { %208 = shalt.err (!%p205_p6)
}
  0x39   :  { %s209_s10 = scalar_lea.hbm %s283_s2, 128 }
  0x3a   :  { %p210_p7 = scmp.ne.s32.totalorder %s283_s2, %s209_s10  ;;  %p213_p8 = scmp.lt.u32.totalorder %s209_s10, %s283_s2 }
  0x3c   :  { %p215_p9 = pnand %p213_p8, %p210_p7 }
  0x3e   :  { %218 = shalt.err (!%p215_p9)
}
  0x3f   :  { %136 = dma.vmem_to_hbm [thread:$0]  %s134_s6, 128, %s283_s2, [#allocation4]  }
  0x40   :  { %223 = dma.done.wait [#allocation4], 128  }
  0x41   :  { %224 = vsyncadd [#allocation4], 4294967168 }
  0x42   :  { %140 = vsyncpa [#allocation3], 1 }
  0x43   :  { %141 = vsyncpa [#allocation6], 1 }
  0x44   :  { %142 = vsyncpa [#allocation4], 1 }

</bundles_post_ra>
